<compile_context>
chip_gen: v7x
topology: tpu7x:2x2x1
jax: 0.10.0
libtpu: 0.0.40
codegen_flags: <defaults>
</compile_context>

<pallas_src>
import jax
import jax.numpy as jnp
from jax.experimental import pallas as pl
from jax.experimental.pallas import tpu as pltpu

_LANES = 128
# (2048, 128) f32 tile = 1 MiB; in+out double-buffered ~= 4 MiB -> fits every
# generation's scoped-VMEM default (16 MiB v5e, 32 MiB v6e/v7x).
_MAX_BLOCK_ROWS = 2048


def _qsilu_kernel(params_ref, x_ref, o_ref):
    # params (SMEM scalars):
    #   [inv_pre_scale, pre_scale, inv_post_scale6, post_scale, cmin, cmax]
    inv_pre = params_ref[0]
    pre_scale = params_ref[1]
    inv_scale6 = params_ref[2]   # 1 / (6 * post_scale)
    post_scale = params_ref[3]
    cmin = params_ref[4]         # -128 - post_zp  (zero point folded into clip bounds)
    cmax = params_ref[5]         #  127 - post_zp

    x = x_ref[...].astype(jnp.float32)   # upcast in-register; HBM stays narrow

    # 1. pre-activation clamp: clamp_values=(-4.0, None)
    xc = jnp.maximum(x, -4.0)

    # 2. pre-activation quantize: 8-bit symmetric, no zero point.
    #    Calibration sets pre_scale = max|xc| / 127, so |xc * inv_pre| <= 127 by
    #    construction (sub-ulp overshoot still rounds to +/-127) -> no clip needed.
    q = jnp.round(xc * inv_pre)

    # 3. hard-SiLU (x * relu6(x+3)/6) on the quantized grid, requantized into the
    #    post-quantizer's int8 domain (zero point folded into the clip bounds)
    xr = q * pre_scale
    r = jnp.round(xr * jnp.clip(xr + 3.0, 0.0, 6.0) * inv_scale6)

    # 4. post-activation dequantize
    o_ref[...] = (jnp.clip(r, cmin, cmax) * post_scale).astype(o_ref.dtype)


def _calibrate(x):
    """Observer pass: derive quantizer params from the current input.

    One fused min/max reduction over x; the post-quantizer range is obtained by
    evaluating hard-SiLU over the (<=255-point) quantized grid spanned by the data,
    so no second full pass over x is needed.
    """
    x_min = jnp.min(x).astype(jnp.float32)
    x_max = jnp.max(x).astype(jnp.float32)
    # clamp is monotone -> fold it into the reduced scalars
    xc_min = jnp.maximum(x_min, -4.0)
    xc_max = jnp.maximum(x_max, -4.0)
    absmax = jnp.maximum(xc_max, -xc_min)

    pre_scale = jnp.maximum(absmax, 1e-8) / 127.0
    inv_pre = 1.0 / pre_scale
    q_min = jnp.clip(jnp.round(xc_min * inv_pre), -127.0, 127.0)
    q_max = jnp.clip(jnp.round(xc_max * inv_pre), -127.0, 127.0)

    # hard-SiLU over every quantized grid point in [q_min, q_max] (255 scalar evals).
    k = jnp.arange(-127, 128, dtype=jnp.float32)
    v = k * pre_scale
    h = v * jnp.clip(v + 3.0, 0.0, 6.0) * (1.0 / 6.0)
    in_range = (k >= q_min) & (k <= q_max)
    y_min = jnp.minimum(jnp.min(jnp.where(in_range, h, jnp.inf)), 0.0)
    y_max = jnp.maximum(jnp.max(jnp.where(in_range, h, -jnp.inf)), 0.0)

    post_scale = jnp.maximum(y_max - y_min, 1e-8) / 255.0
    post_zp = jnp.clip(jnp.round(-128.0 - y_min / post_scale), -128.0, 127.0)
    inv_scale6 = 1.0 / (6.0 * post_scale)
    cmin = -128.0 - post_zp
    cmax = 127.0 - post_zp
    return jnp.stack(
        [inv_pre, pre_scale, inv_scale6, post_scale, cmin, cmax]
    ).astype(jnp.float32)


def _elementwise(x, params):
    """Same math as the kernel, in plain jnp (used for tails and as the reference)."""
    inv_pre, pre_scale, inv_scale6, post_scale, cmin, cmax = (
        params[i] for i in range(6)
    )
    xf = x.astype(jnp.float32)
    xc = jnp.maximum(xf, -4.0)
    q = jnp.round(xc * inv_pre)
    xr = q * pre_scale
    r = jnp.round(xr * jnp.clip(xr + 3.0, 0.0, 6.0) * inv_scale6)
    return (jnp.clip(r, cmin, cmax) * post_scale).astype(x.dtype)


@jax.jit
def qsilu_approx(x):
    """Pallas TPU implementation of QSiLUApprox.forward."""
    orig_shape = x.shape
    orig_dtype = x.dtype
    n = x.size

    params = _calibrate(x)

    flat = x.reshape(-1)              # contiguous -> free reshape
    rows_full = n // _LANES
    rem = n - rows_full * _LANES

    if rows_full == 0:
        # Tiny input: the fused jnp path is cheaper than a kernel launch.
        return _elementwise(flat, params).reshape(orig_shape)

    main = flat if rem == 0 else flat[: rows_full * _LANES]
    x2d = main.reshape(rows_full, _LANES)   # lane-dense slab

    # Biggest tile that fits comfortably: single full-array block when possible,
    # otherwise 2048-row blocks (multiple of 8 -> valid; partial last block masked).
    block_rows = rows_full if rows_full <= _MAX_BLOCK_ROWS else _MAX_BLOCK_ROWS
    grid = (pl.cdiv(rows_full, block_rows),)

    out2d = pl.pallas_call(
        _qsilu_kernel,
        out_shape=jax.ShapeDtypeStruct((rows_full, _LANES), orig_dtype),
        grid=grid,
        in_specs=[
            pl.BlockSpec(memory_space=pltpu.SMEM),                  # scalar params
            pl.BlockSpec((block_rows, _LANES), lambda i: (i, 0)),   # x tile
        ],
        out_specs=pl.BlockSpec((block_rows, _LANES), lambda i: (i, 0)),
        compiler_params=pltpu.CompilerParams(
            dimension_semantics=("parallel",)),
    )(params, x2d)

    out = out2d.reshape(-1)
    if rem != 0:
        # <=127-element tail: fused jnp, no full-tensor pad / slice passes.
        tail_out = _elementwise(flat[rows_full * _LANES:], params)
        out = jnp.concatenate([out, tail_out])
    return out.reshape(orig_shape)


def _reference(x):
    """Pure-JAX reference mirroring the kernel's reconstructed semantics exactly."""
    return _elementwise(x, _calibrate(x))


if __name__ == "__main__":
    key = jax.random.PRNGKey(0)

    # NCHW input, same convention as the PyTorch module (lane-aligned size).
    x = 2.0 * jax.random.normal(key, (2, 4, 16, 16), dtype=jnp.float32)
    y = jax.block_until_ready(qsilu_approx(x))
    assert y.shape == x.shape
    assert y.dtype == x.dtype
    y_ref = _reference(x)
    assert jnp.allclose(y, y_ref, atol=1e-5, rtol=1e-5), "mismatch vs JAX reference"

    # Misaligned size (n % 128 != 0): Pallas on the aligned prefix + fused jnp tail.
    key2, _ = jax.random.split(key)
    x2 = 2.0 * jax.random.normal(key2, (2, 3, 7, 7), dtype=jnp.float32)
    y2 = jax.block_until_ready(qsilu_approx(x2))
    assert y2.shape == x2.shape
    assert jnp.allclose(y2, _reference(x2), atol=1e-5, rtol=1e-5), \
        "mismatch vs JAX reference (misaligned path)"

    print("KERNEL_OK")
</pallas_src>

<mosaic_0001>
module attributes {stable_mosaic.version = 11 : i64} {
  func.func @_qsilu_kernel(%arg0: i32, %arg1: memref<6xf32, #tpu.memory_space<smem>>, %arg2: memref<16x128xf32, #tpu.memory_space<vmem>>, %arg3: memref<16x128xf32, #tpu.memory_space<vmem>>) attributes {dimension_semantics = [#tpu.dimension_semantics<parallel>], iteration_bounds = array<i64: 1>, scalar_prefetch = 0 : i64, scratch_operands = 0 : i64, tpu.core_type = #tpu.core_type<tc>, window_params = [{transform_indices = @transform_0, window_bounds = array<i64: 6>}, {transform_indices = @transform_1, window_bounds = array<i64: 16, 128>}, {transform_indices = @transform_2, window_bounds = array<i64: 16, 128>}]} {
    %c0 = arith.constant 0 : index
    %0 = memref.load %arg1[%c0] : memref<6xf32, #tpu.memory_space<smem>>
    %c1 = arith.constant 1 : index
    %1 = memref.load %arg1[%c1] : memref<6xf32, #tpu.memory_space<smem>>
    %c2 = arith.constant 2 : index
    %2 = memref.load %arg1[%c2] : memref<6xf32, #tpu.memory_space<smem>>
    %c3 = arith.constant 3 : index
    %3 = memref.load %arg1[%c3] : memref<6xf32, #tpu.memory_space<smem>>
    %c4 = arith.constant 4 : index
    %4 = memref.load %arg1[%c4] : memref<6xf32, #tpu.memory_space<smem>>
    %c5 = arith.constant 5 : index
    %5 = memref.load %arg1[%c5] : memref<6xf32, #tpu.memory_space<smem>>
    %c0_0 = arith.constant 0 : index
    %c0_1 = arith.constant 0 : index
    %6 = vector.load %arg2[%c0_0, %c0_1] : memref<16x128xf32, #tpu.memory_space<vmem>>, vector<16x128xf32>
    %cst = arith.constant -4.000000e+00 : f32
    %7 = vector.broadcast %cst : f32 to vector<16x128xf32>
    %8 = arith.maximumf %6, %7 : vector<16x128xf32>
    %9 = vector.broadcast %0 : f32 to vector<16x128xf32>
    %10 = arith.mulf %8, %9 : vector<16x128xf32>
    %11 = math.roundeven %10 : vector<16x128xf32>
    %12 = vector.broadcast %1 : f32 to vector<16x128xf32>
    %13 = arith.mulf %11, %12 : vector<16x128xf32>
    %cst_2 = arith.constant 3.000000e+00 : f32
    %14 = vector.broadcast %cst_2 : f32 to vector<16x128xf32>
    %15 = arith.addf %13, %14 : vector<16x128xf32>
    %cst_3 = arith.constant 0.000000e+00 : f32
    %cst_4 = arith.constant 6.000000e+00 : f32
    %16 = vector.broadcast %cst_3 : f32 to vector<16x128xf32>
    %17 = arith.maximumf %16, %15 : vector<16x128xf32>
    %18 = vector.broadcast %cst_4 : f32 to vector<16x128xf32>
    %19 = arith.minimumf %18, %17 : vector<16x128xf32>
    %20 = arith.mulf %13, %19 : vector<16x128xf32>
    %21 = vector.broadcast %2 : f32 to vector<16x128xf32>
    %22 = arith.mulf %20, %21 : vector<16x128xf32>
    %23 = math.roundeven %22 : vector<16x128xf32>
    %24 = vector.broadcast %4 : f32 to vector<16x128xf32>
    %25 = arith.maximumf %24, %23 : vector<16x128xf32>
    %26 = vector.broadcast %5 : f32 to vector<16x128xf32>
    %27 = arith.minimumf %26, %25 : vector<16x128xf32>
    %28 = vector.broadcast %3 : f32 to vector<16x128xf32>
    %29 = arith.mulf %27, %28 : vector<16x128xf32>
    %c0_5 = arith.constant 0 : index
    %c0_6 = arith.constant 0 : index
    %30 = vector.load %arg3[%c0_5, %c0_6] : memref<16x128xf32, #tpu.memory_space<vmem>>, vector<16x128xf32>
    tpu.vector_store %arg3[%c0_5, %c0_6], %29 {strides = array<i32>} : memref<16x128xf32, #tpu.memory_space<vmem>>, vector<16x128xf32>,
    return
  }
  func.func @transform_0(%arg0: i32) -> i32 {
    %c0_i32 = arith.constant 0 : i32
    %c0_i32_0 = arith.constant 0 : i32
    return %c0_i32 : i32
  }
  func.func @transform_1(%arg0: i32) -> (i32, i32) {
    %c0_i32 = arith.constant 0 : i32
    %c0_i32_0 = arith.constant 0 : i32
    return %arg0, %c0_i32 : i32, i32
  }
  func.func @transform_2(%arg0: i32) -> (i32, i32) {
    %c0_i32 = arith.constant 0 : i32
    %c0_i32_0 = arith.constant 0 : i32
    return %arg0, %c0_i32 : i32, i32
  }
}

</mosaic_0001>

<bundles_post_ra>
// kernel: qsilu_approx.1
= control target key start
LH: loop header
LB: loop body
LE: loop exit
PB: predicated region body
PF: predicated region fallthrough
CT: control target
= control target key end

     0   :  { %7 = vsyncpa [#allocation3], 0  ;;  %s126_s0 = inlined_call_operand.vmem [shape: f32[6], index: 0, kind: input, shape index: {}]   ;;  %s127_s1 = inlined_call_operand.vmem [shape: f32[16,128], index: 1, kind: input, shape index: {}]   ;;  %s128_s2 = inlined_call_operand.vmem [shape: f32[16,128], index: 2, kind: output, shape index: {}]  }
   0x1   :  { %s14_s11 = sshll.u32 %s126_s0, 4  ;;  %s15_s11 = int_to_ptr.vmem [resolvable:$true] %s14_s11 }
   0x2   :  { %s81_s12 = scalar_lea.vmem %s15_s11, 16  ;;  %p86_p1 = scmp.lt.s32.totalorder %s15_s11, %s15_s11 }
   0x3   :  { %p82_p0 = scmp.ne.s32.totalorder %s15_s11, %s81_s12  ;;  %p87_p2 = scmp.lt.s32.totalorder %s81_s12, %s81_s12 }
   0x5   :  { %p88_p3 = por %p87_p2, %p86_p1 }
   0x7   :  { %p89_p4 = pnand %p88_p3, %p82_p0 }
   0x9   :  { %92 = shalt.err (!%p89_p4)
}
   0xa   :  { %s95_s13 = smov [#allocation2]  }
   0xb   :  { %17 = dma.vmem_to_smem %s15_s11, 16, %s95_s13, [#allocation3]  }
   0xc   :  { %93 = dma.done.wait [#allocation3], 16  }
   0xd   :  { %94 = vsyncadd [#allocation3], 4294967280 }
   0xe   :  { %23 = sfence }
   0xf   :  { %s24_s14 = sld [smem:[#allocation2]]  ;;  %s71_s15 = sld [smem:[#allocation2 + $0x1]]  ;;  %v30_v0 = vld [vmem:[%s127_s1] sm:$0xff]  ;;  %v31_v1 = vld [vmem:[%s127_s1 + $0x8] sm:$0xff] }
  0x10   :  { %v32_v2 = vmax.f32 %v30_v0, -4.0  ;;  %v33_v3 = vmax.f32 %v31_v1, -4.0  ;;  %s72_s19 = sld [smem:[#allocation2 + $0x2]]  ;;  %s74_s20 = sld [smem:[#allocation2 + $0x4]] }
  0x11   :  { %s75_s21 = sld [smem:[#allocation2 + $0x5]]  ;;  %s73_s1 = sld [smem:[#allocation2 + $0x3]] }
  0x15   :  { %v34_v4 = vstv %s24_s14  ;;  %v39_v7 = vstv %s71_s15 }
  0x16   :  { %v35_v5 = vmul.f32 %v34_v4, %v32_v2  ;;  %v36_v6 = vmul.f32 %v34_v4, %v33_v3  ;;  %v50_v18 = vstv %s72_s19  ;;  %v55_v23 = vstv %s74_s20 }
  0x17   :  { %v58_v26 = vstv %s75_s21  ;;  %v61_v29 = vstv %s73_s1 }
  0x18   :  { %v76_v8 = vround.rtne.f32 %v35_v5  ;;  %v77_v9 = vround.rtne.f32 %v36_v6 }
  0x1a   :  { %v40_v10 = vmul.f32 %v76_v8, %v39_v7  ;;  %v41_v11 = vmul.f32 %v77_v9, %v39_v7 }
  0x1c   :  { %v42_v12 = vadd.f32 3.0, %v40_v10  ;;  %v43_v13 = vadd.f32 3.0, %v41_v11 }
  0x1e   :  { %v44_v14 = vmax.f32 %v42_v12, 0.0  ;;  %v45_v15 = vmax.f32 %v43_v13, 0.0 }
  0x20   :  { %v46_v16 = vmin.f32 %v44_v14, 6.0  ;;  %v47_v17 = vmin.f32 %v45_v15, 6.0 }
  0x22   :  { %v48_v19 = vmul.f32 %v46_v16, %v40_v10  ;;  %v49_v20 = vmul.f32 %v47_v17, %v41_v11 }
  0x24   :  { %v51_v21 = vmul.f32 %v50_v18, %v48_v19  ;;  %v52_v22 = vmul.f32 %v50_v18, %v49_v20 }
  0x26   :  { %v78_v24 = vround.rtne.f32 %v51_v21  ;;  %v79_v25 = vround.rtne.f32 %v52_v22 }
  0x28   :  { %v56_v27 = vmax.f32 %v55_v23, %v78_v24  ;;  %v57_v28 = vmax.f32 %v55_v23, %v79_v25 }
  0x2a   :  { %v59_v30 = vmin.f32 %v58_v26, %v56_v27  ;;  %v60_v31 = vmin.f32 %v58_v26, %v57_v28 }
  0x2c   :  { %v62_v32 = vmul.f32 %v61_v29, %v59_v30  ;;  %v63_v33 = vmul.f32 %v61_v29, %v60_v31 }
  0x2e   :  { %64 = vst [vmem:[%s128_s2] sm:$0xff] %v62_v32  ;;  %65 = vst [vmem:[%s128_s2 + $0x8] sm:$0xff] %v63_v33 }
  0x2f   :  { %70 = vsyncpa [#allocation3], 1 }

</bundles_post_ra>
